<compile_context>
chip_gen: v7x
topology: tpu7x:2x2x1
jax: 0.10.0
libtpu: 0.0.40
codegen_flags: <defaults>
</compile_context>

<pallas_src>
import jax
import jax.numpy as jnp
from jax import lax
from jax.experimental import pallas as pl
from jax.experimental.pallas import tpu as pltpu


def _vmem_limit_bytes():
    """Per-generation scoped-VMEM limit (v5e/v6e: 128 MiB physical, v7x: 64 MiB)."""
    try:
        cap = int(pltpu.get_tpu_info().vmem_capacity_bytes)
    except Exception:
        cap = 64 * 1024 * 1024  # v7x physical capacity -> safe fallback on every generation
    return max(32 * 1024 * 1024, min(cap - 16 * 1024 * 1024, 100 * 1024 * 1024))


def data_embedding_inverted(
    x,
    x_mark,
    weight,
    bias,
    *,
    compute_dtype=jnp.float32,   # jnp.bfloat16: bf16 MXU feed w/ f32 accumulate (use on v5e)
    out_dtype=jnp.float32,       # jnp.bfloat16 halves the dominant HBM write when d_model >= L
):
    """JAX/Pallas equivalent of DataEmbedding_inverted.forward (eval mode).

    x      : [B, L, N] floating
    x_mark : [B, L, M] floating or None
    weight : [d_model, L]  (PyTorch nn.Linear weight layout)
    bias   : [d_model]
    returns: [B, N(+M), d_model] in out_dtype
    """
    B, L, N = x.shape
    d_model, L_w = weight.shape
    assert L_w == L, "weight must be (d_model, L) with L == x.shape[1]"
    has_mark = x_mark is not None
    M = x_mark.shape[-1] if has_mark else 0
    V = N + M

    # Weight pre-transposed to (L, d_model): contraction dim lands on sublanes, the
    # natural MXU RHS.  Tiny one-time wrapper op (weight-sized), also hoists the
    # per-step weight cast out of the kernel.  Bias stays f32, added post-accumulate.
    wt = jnp.asarray(weight).T.astype(compute_dtype)
    b2 = jnp.asarray(bias).reshape(1, d_model).astype(jnp.float32)

    x_item = jnp.dtype(x.dtype).itemsize
    xm_item = jnp.dtype(x_mark.dtype).itemsize if has_mark else 0
    w_item = jnp.dtype(wt.dtype).itemsize
    o_item = jnp.dtype(out_dtype).itemsize

    vmem_limit = _vmem_limit_bytes()
    budget = int(0.70 * vmem_limit)      # headroom for compiler temporaries

    def working_set(tb, td):
        # Streamed blocks are double-buffered by the BlockSpec pipeline; count the
        # resident weight/bias conservatively at 2x as well.
        stream = tb * L * (N * x_item + M * xm_item) + tb * V * td * o_item
        resident = L * td * w_item + td * 4
        return 2 * (stream + resident)

    # --- d_model tiling: only split when a single-D block would not fit.
    # Halving keeps td a multiple of 128 (lane-dense stores).
    td = d_model
    while working_set(1, td) > budget and td % 256 == 0:
        td //= 2
    nd = d_model // td

    # --- batch tiling: grow TB while it fits the VMEM budget, but keep >=2 batch
    # tiles whenever B > 1 so a parallel grid axis has work for both v7x TensorCores.
    tb_cap = min(16, pl.cdiv(B, 2)) if B > 1 else 1
    tb = 1
    while tb * 2 <= tb_cap and working_set(tb * 2, td) <= budget:
        tb *= 2
    nb = pl.cdiv(B, tb)

    if nb * nd == 1 and d_model % 256 == 0:
        # B == 1: split d_model so the second TensorCore on v7x is not idle.
        td = d_model // 2
        nd = 2

    def kernel(*refs):
        if has_mark:
            x_ref, xm_ref, wt_ref, b_ref, o_ref = refs
        else:
            x_ref, wt_ref, b_ref, o_ref = refs
        w = wt_ref[...]            # (L, td), compute_dtype, resident across grid steps
        bvec = b_ref[...]          # (1, td), f32
        # Contract L: folds the [B, L, V] -> [B, V, L] permute into the MXU feed.
        dn = (((0,), (0,)), ((), ()))
        for t in range(tb):        # static unroll; tb is small (<= 16)
            xv = x_ref[t].astype(compute_dtype)                      # (L, N) in-register cast
            acc = lax.dot_general(xv, w, dn, preferred_element_type=jnp.float32)
            o_ref[t, 0:N, :] = (acc + bvec).astype(o_ref.dtype)      # variates rows [0, N)
            if has_mark:
                xm = xm_ref[t].astype(compute_dtype)                 # (L, M)
                accm = lax.dot_general(xm, w, dn, preferred_element_type=jnp.float32)
                o_ref[t, N:V, :] = (accm + bvec).astype(o_ref.dtype)  # mark rows [N, N+M)

    in_specs = [pl.BlockSpec((tb, L, N), lambda ib, jd: (ib, 0, 0))]
    inputs = [x]
    if has_mark:
        in_specs.append(pl.BlockSpec((tb, L, M), lambda ib, jd: (ib, 0, 0)))
        inputs.append(x_mark)
    in_specs += [
        pl.BlockSpec((L, td), lambda ib, jd: (0, jd)),   # DMA'd once / resident when nd == 1
        pl.BlockSpec((1, td), lambda ib, jd: (0, jd)),
    ]
    inputs += [wt, b2]

    flops = 2 * B * V * L * d_model
    bytes_accessed = (
        x.size * x_item
        + (x_mark.size * xm_item if has_mark else 0)
        + wt.size * w_item
        + b2.size * 4
        + B * V * d_model * o_item
    )

    out = pl.pallas_call(
        kernel,
        out_shape=jax.ShapeDtypeStruct((B, V, d_model), out_dtype),
        grid_spec=pltpu.PrefetchScalarGridSpec(
            num_scalar_prefetch=0,
            grid=(nb, nd),
            in_specs=in_specs,
            out_specs=pl.BlockSpec((tb, V, td), lambda ib, jd: (ib, 0, jd)),
        ),
        compiler_params=pltpu.CompilerParams(
            dimension_semantics=("parallel", "parallel"),
            vmem_limit_bytes=vmem_limit,
        ),
        cost_estimate=pl.CostEstimate(
            flops=flops, transcendentals=0, bytes_accessed=bytes_accessed
        ),
    )(*inputs)

    # TODO(synk): nn.Dropout(p=0.1) is identity in eval mode; training-mode dropout
    # is not implemented here.
    return out


def _reference(x, x_mark, weight, bias):
    xt = jnp.transpose(x, (0, 2, 1))
    if x_mark is not None:
        xt = jnp.concatenate([xt, jnp.transpose(x_mark, (0, 2, 1))], axis=1)
    return jnp.einsum("bvl,dl->bvd", xt, weight) + bias


if __name__ == "__main__":
    key = jax.random.PRNGKey(0)

    def make_case(k, B, L, N, M, d_model):
        k_x, k_m, k_w, k_b = jax.random.split(k, 4)
        x = jax.random.normal(k_x, (B, L, N), dtype=jnp.float32)
        x_mark = jax.random.normal(k_m, (B, L, M), dtype=jnp.float32) if M else None
        bound = 1.0 / (L ** 0.5)   # nn.Linear(L, d_model) default init range
        weight = jax.random.uniform(k_w, (d_model, L), jnp.float32, -bound, bound)
        bias = jax.random.uniform(k_b, (d_model,), jnp.float32, -bound, bound)
        return x, x_mark, weight, bias

    k0, k1 = jax.random.split(key)

    # Small canonical case: batch=2, seq=8, variates=4, time-features=3, d_model=32.
    x, x_mark, weight, bias = make_case(k0, B=2, L=8, N=4, M=3, d_model=32)
    ref = _reference(x, x_mark, weight, bias)

    out = jax.block_until_ready(data_embedding_inverted(x, x_mark, weight, bias))
    assert out.shape == (2, 7, 32), out.shape
    assert jnp.allclose(out, ref, atol=1e-5, rtol=1e-5), "f32 mismatch vs reference"

    # bf16 streaming compute + bf16 output (bandwidth-optimal path; f32 accumulate/bias).
    out_bf16 = jax.block_until_ready(
        data_embedding_inverted(x, x_mark, weight, bias,
                                compute_dtype=jnp.bfloat16,
                                out_dtype=jnp.bfloat16))
    assert out_bf16.dtype == jnp.bfloat16
    assert jnp.allclose(out_bf16.astype(jnp.float32), ref, atol=5e-2, rtol=5e-2), \
        "bf16 mismatch vs reference"

    # x_mark is None branch of the module.
    out_nm = jax.block_until_ready(data_embedding_inverted(x, None, weight, bias))
    assert out_nm.shape == (2, 4, 32)
    assert jnp.allclose(out_nm, _reference(x, None, weight, bias), atol=1e-5, rtol=1e-5), \
        "x_mark=None mismatch vs reference"

    # Odd batch: exercises batch blocking (tb=2) with a ragged, masked final tile.
    x2, xm2, w2, b2v = make_case(k1, B=5, L=16, N=6, M=2, d_model=64)
    out2 = jax.block_until_ready(data_embedding_inverted(x2, xm2, w2, b2v))
    assert out2.shape == (5, 8, 64)
    assert jnp.allclose(out2, _reference(x2, xm2, w2, b2v), atol=1e-5, rtol=1e-5), \
        "ragged-batch mismatch vs reference"

    print("KERNEL_OK")
</pallas_src>

<mosaic_0001>
module attributes {stable_mosaic.version = 11 : i64} {
  func.func @kernel(%arg0: i32, %arg1: i32, %arg2: memref<1x8x4xf32, #tpu.memory_space<vmem>>, %arg3: memref<1x8x3xf32, #tpu.memory_space<vmem>>, %arg4: memref<8x32xf32, #tpu.memory_space<vmem>>, %arg5: memref<1x32xf32, #tpu.memory_space<vmem>>, %arg6: memref<1x7x32xf32, #tpu.memory_space<vmem>>) attributes {dimension_semantics = [#tpu.dimension_semantics<parallel>, #tpu.dimension_semantics<parallel>], iteration_bounds = array<i64: 2, 1>, scalar_prefetch = 0 : i64, scratch_operands = 0 : i64, tpu.core_type = #tpu.core_type<tc>, window_params = [{transform_indices = @transform_0, window_bounds = array<i64: 1, 8, 4>}, {transform_indices = @transform_1, window_bounds = array<i64: 1, 8, 3>}, {transform_indices = @transform_2, window_bounds = array<i64: 8, 32>}, {transform_indices = @transform_3, window_bounds = array<i64: 1, 32>}, {transform_indices = @transform_4, window_bounds = array<i64: 1, 7, 32>}]} {
    %c0 = arith.constant 0 : index
    %c0_0 = arith.constant 0 : index
    %0 = vector.load %arg4[%c0, %c0_0] : memref<8x32xf32, #tpu.memory_space<vmem>>, vector<8x32xf32>
    %c0_1 = arith.constant 0 : index
    %c0_2 = arith.constant 0 : index
    %1 = vector.load %arg5[%c0_1, %c0_2] : memref<1x32xf32, #tpu.memory_space<vmem>>, vector<1x32xf32>
    %c0_3 = arith.constant 0 : index
    %c0_4 = arith.constant 0 : index
    %c0_5 = arith.constant 0 : index
    %2 = vector.load %arg2[%c0_3, %c0_4, %c0_5] : memref<1x8x4xf32, #tpu.memory_space<vmem>>, vector<1x8x4xf32>
    %3 = vector.shape_cast %2 : vector<1x8x4xf32> to vector<8x4xf32>
    %cst = arith.constant dense<0.000000e+00> : vector<4x32xf32>
    %4 = tpu.matmul %3, %0, %cst {dimension_numbers = #tpu.dot_dimension_numbers<[0], [0], [1], [1], [0, 1, 1, 1], [], []>} : vector<8x4xf32>, vector<8x32xf32>, vector<4x32xf32> -> vector<4x32xf32>
    %5 = vector.broadcast %1 : vector<1x32xf32> to vector<4x32xf32>
    %6 = arith.addf %4, %5 : vector<4x32xf32>
    %c0_6 = arith.constant 0 : index
    %c0_7 = arith.constant 0 : index
    %c0_8 = arith.constant 0 : index
    %7 = vector.load %arg6[%c0_6, %c0_7, %c0_8] : memref<1x7x32xf32, #tpu.memory_space<vmem>>, vector<1x4x32xf32>
    %8 = vector.shape_cast %7 : vector<1x4x32xf32> to vector<4x32xf32>
    %9 = vector.shape_cast %6 : vector<4x32xf32> to vector<1x4x32xf32>
    tpu.vector_store %arg6[%c0_6, %c0_7, %c0_8], %9 {strides = array<i32>} : memref<1x7x32xf32, #tpu.memory_space<vmem>>, vector<1x4x32xf32>,
    %c0_9 = arith.constant 0 : index
    %c0_10 = arith.constant 0 : index
    %c0_11 = arith.constant 0 : index
    %10 = vector.load %arg3[%c0_9, %c0_10, %c0_11] : memref<1x8x3xf32, #tpu.memory_space<vmem>>, vector<1x8x3xf32>
    %11 = vector.shape_cast %10 : vector<1x8x3xf32> to vector<8x3xf32>
    %cst_12 = arith.constant dense<0.000000e+00> : vector<3x32xf32>
    %12 = tpu.matmul %11, %0, %cst_12 {dimension_numbers = #tpu.dot_dimension_numbers<[0], [0], [1], [1], [0, 1, 1, 1], [], []>} : vector<8x3xf32>, vector<8x32xf32>, vector<3x32xf32> -> vector<3x32xf32>
    %13 = vector.broadcast %1 : vector<1x32xf32> to vector<3x32xf32>
    %14 = arith.addf %12, %13 : vector<3x32xf32>
    %c0_13 = arith.constant 0 : index
    %c4 = arith.constant 4 : index
    %c0_14 = arith.constant 0 : index
    %15 = vector.load %arg6[%c0_13, %c4, %c0_14] : memref<1x7x32xf32, #tpu.memory_space<vmem>>, vector<1x3x32xf32>
    %16 = vector.shape_cast %15 : vector<1x3x32xf32> to vector<3x32xf32>
    %17 = vector.shape_cast %14 : vector<3x32xf32> to vector<1x3x32xf32>
    tpu.vector_store %arg6[%c0_13, %c4, %c0_14], %17 {strides = array<i32>} : memref<1x7x32xf32, #tpu.memory_space<vmem>>, vector<1x3x32xf32>,
    return
  }
  func.func @transform_0(%arg0: i32, %arg1: i32) -> (i32, i32, i32) {
    %c0_i32 = arith.constant 0 : i32
    %c0_i32_0 = arith.constant 0 : i32
    %c0_i32_1 = arith.constant 0 : i32
    return %arg0, %c0_i32, %c0_i32_0 : i32, i32, i32
  }
  func.func @transform_1(%arg0: i32, %arg1: i32) -> (i32, i32, i32) {
    %c0_i32 = arith.constant 0 : i32
    %c0_i32_0 = arith.constant 0 : i32
    %c0_i32_1 = arith.constant 0 : i32
    return %arg0, %c0_i32, %c0_i32_0 : i32, i32, i32
  }
  func.func @transform_2(%arg0: i32, %arg1: i32) -> (i32, i32) {
    %c0_i32 = arith.constant 0 : i32
    %c0_i32_0 = arith.constant 0 : i32
    return %c0_i32, %arg1 : i32, i32
  }
  func.func @transform_3(%arg0: i32, %arg1: i32) -> (i32, i32) {
    %c0_i32 = arith.constant 0 : i32
    %c0_i32_0 = arith.constant 0 : i32
    return %c0_i32, %arg1 : i32, i32
  }
  func.func @transform_4(%arg0: i32, %arg1: i32) -> (i32, i32, i32) {
    %c0_i32 = arith.constant 0 : i32
    %c0_i32_0 = arith.constant 0 : i32
    return %arg0, %c0_i32, %arg1 : i32, i32, i32
  }
}

</mosaic_0001>

<bundles_post_ra>
// kernel: tpu_custom_call.1
= control target key start
LH: loop header
LB: loop body
LE: loop exit
PB: predicated region body
PF: predicated region fallthrough
CT: control target
= control target key end

     0   :  { %s703_s15 = smov 0   ;;  %s705_s16 = smov 0   ;;  %s745_s0 = inlined_call_operand.vmem [shape: f32[2,8,4], index: 0, kind: input, shape index: {}]   ;;  %s746_s1 = inlined_call_operand.vmem [shape: f32[2,8,3], index: 1, kind: input, shape index: {}]   ;;  %s747_s2 = inlined_call_operand.vmem [shape: f32[8,32], index: 2, kind: input, shape index: {}]   ;;  %s748_s3 = inlined_call_operand.vmem [shape: f32[1,32], index: 3, kind: input, shape index: {}]   ;;  %s749_s4 = inlined_call_operand.vmem [shape: f32[2,7,32], index: 4, kind: output, shape index: {}]  }
   0x1   :  { %s707_s17 = smov 0  }
   0x2 LB: > { %s26_s18 = sadd.s32 1, %s670_s16  ;;  %p603_p0 = scmp.ge.s32.totalorder %s674_s17, 1  ;;  %s674_s17 = sphi %s707_s17, %s14_s17   ;;  %s670_s16 = sphi %s705_s16, %s751_s16   ;;  %s666_s15 = sphi %s703_s15, %s750_s15  }
   0x3   : > { %p28_p1 = scmp.ge.s32.totalorder %s26_s18, 2  ;;  %p201_p2 = scmp.lt.s32.totalorder %s674_s17, 3 }
   0x5   : > { %s753_s18 = smov (%p28_p1, %s26_s18), 0  ;;  %p202_p3 = pnand %p603_p0, %p201_p2 }
   0x6   : > { %p239_p4 = scmp.lt.s32.totalorder (!%p202_p3), %s666_s15, 1  ;;  %v261_v0 = vld [vmem:[%s747_s2] sm:$0xff] (!%p202_p3)  ;;  %v676_v1 = vmov (!%p202_p3), 0.0   ;;  %vm677_vm0 = vmmov (!%p202_p3), 0   ;;  %vm302_vm1 = vcmask (!%p202_p3), 64512   ;;  %vm376_vm2 = vcmask (!%p202_p3), 257024  }
   0x7   : > { %205 = sbr.rel (%p202_p3) target bundleno = 366 (0x16e), region = 36  ;;  %616 = vmatprep.subr.mxu0 (!%p202_p3), %v676_v1  ;;  %618 = vmatprep.mubr.msk.f32.mxu0 (!%p202_p3), %vm677_vm0, %v676_v1  ;;  %v607_v6 = vld [vmem:[%s748_s3] ss:$0 sm:$0xff] (!%p202_p3)  ;;  %vm484_vm3 = vcmask (!%p202_p3), 256000  }
   0x8   : > { %617 = vmatpush3.msra.mxu0 (!%p202_p3), %v261_v0  ;;  %621 = vmatprep.subr.mxu1 (!%p202_p3), %v676_v1 }
   0x9   : > { %622 = vmatpush3.msra.mxu1 (!%p202_p3), %v261_v0  ;;  %623 = vmatprep.mubr.msk.f32.mxu1 (!%p202_p3), %vm677_vm0, %v676_v1 }
   0xe   : > { %s755_s15 = smov (!%p239_p4, %s666_s15), 1 }
   0xf   : > { %s604_s21 = sshll.u32 %s755_s15, 3 }
  0x10   : > { %s242_s24 = scalar_lea.vmem %s745_s0, %s604_s21  ;;  %s246_s27 = scalar_lea.vmem %s746_s1, %s604_s21 }
  0x11   : > { %v263_v2 = vld [vmem:[%s242_s24] sm:$0xff]  ;;  %s260_s6 = scalar_lea.vmem %s749_s4, %s604_s21 }
  0x12   : > { %270 = vxpose.xlu0.b32.start.end [1/1] (short) (narrow) %v263_v2, 8  ;;  %v378_v3 = vld [vmem:[%s246_s27] sm:$0xff] }
  0x16   : > { %379 = vxpose.xlu0.b32.start.end [1/1] (short) (narrow) %v378_v3, 8 }
  0x92   : > { %v286_v4 = vpop.trf.xlu0 }
  0x93   : > { %619 = vmatmul.mubr.msk.f32.vlgmr.msra.gmra.mrb[0].mxu0 %vm302_vm1, %v286_v4 }
  0x96   : > { %v395_v5 = vpop.trf.xlu0 }
  0x97   : > { %624 = vmatmul.mubr.msk.f32.vlgmr.msra.gmra.mrb[0].mxu1 %vm302_vm1, %v395_v5 }
 0x166   : > { %v372_v7 = vpop.f32.mrb[0].mxu0 }
 0x167   : > { %v373_v8 = vadd.f32 %v607_v6, %v372_v7  ;;  %v620_v9 = vpop.f32.mrb[1].mxu0 }
 0x169   : > { %377 = vst.msk [vmem:[%s260_s6] sm:$0xf] %vm376_vm2, %v373_v8 }
 0x16a   : > { %v480_v10 = vpop.f32.mrb[0].mxu1 }
 0x16b   : > { %v481_v11 = vadd.f32 %v607_v6, %v480_v10  ;;  %v625_v12 = vpop.f32.mrb[1].mxu1 }
 0x16d   : > { %485 = vst.msk [vmem:[%s260_s6 + $0x4] sm:$0x7] %vm484_vm3, %v481_v11 }
 0x16e PF: > { %s14_s17 = sadd.s32 1, %s674_s17   ;;  %s750_s15 = smov %s670_s16 }
 0x16f   : > { %p11_p5 = scmp.ge.s32.totalorder %s14_s17, 4   ;;  %s751_s16 = smov %s753_s18 }
 0x171   :  { %13 = sbr.rel (!%p11_p5) target bundleno = 2 (0x2), region = 75 }

</bundles_post_ra>
